<compile_context>
chip_gen: v6e
topology: v6e:2x2x1
jax: 0.10.0
libtpu: 0.0.40
codegen_flags: <defaults>
</compile_context>

<pallas_src>
import math

import jax
import jax.numpy as jnp
from jax.experimental import pallas as pl
from jax.experimental.pallas import tpu as pltpu


_PI_T = 3.14159265  # the constant hard-coded in the PyTorch module (not math.pi)

# cos(m*theta) as a polynomial in cos(theta) -- mirrors the PyTorch `mlambda` list.
_MLAMBDA = {
    0: lambda x: jnp.ones_like(x),
    1: lambda x: x,
    2: lambda x: 2.0 * x * x - 1.0,
    3: lambda x: (4.0 * x * x - 3.0) * x,
    4: lambda x: 8.0 * (x * x) * (x * x) - 8.0 * (x * x) + 1.0,
    5: lambda x: (16.0 * (x * x) * (x * x) - 20.0 * (x * x) + 5.0) * x,
}


def _ceil_to(x, n):
    return ((x + n - 1) // n) * n


def _pick_block_b(batch, max_block_b):
    """Large batch blocks (amortize per-step overhead) but keep >=8 steps when the
    batch is big enough so both v7x TensorCores pipeline several steps each."""
    bb = min(_ceil_to(max(batch, 1), 8), max_block_b)
    while batch // bb < 8 and bb > 256:
        bb //= 2
    return bb


def _make_sphere_kernel(m, lamb, eps, tile_c):
    """Fused SphereProduct kernel for one (batch block, C tile)."""
    # theta >= j*pi/m  <=>  cos(theta) <= cos(j*pi_t/m)   (acos is decreasing)
    thresholds = tuple(float(math.cos(j * _PI_T / m)) for j in range(1, m + 1))
    inv_1p_lamb = 1.0 / (1.0 + lamb)
    eps_sq = eps * eps

    def kernel(x_ref, wnt_ref, label_ref, out_ref):
        x = x_ref[...]            # (bb, D)  f32
        lbl = label_ref[...]      # (bb, 1)  int32
        wnt = wnt_ref[...]        # (D, tile_c), already L2-normalized in the wrapper

        # --- F.normalize(input, dim=1) via rsqrt (EUP), NormOfFeature = ||x|| ---
        sumsq = jnp.sum(x * x, axis=1, keepdims=True)            # (bb, 1)
        inv_norm = jax.lax.rsqrt(jnp.maximum(sumsq, eps_sq))
        xn = x * inv_norm
        norm_x = sumsq * inv_norm                                 # == sqrt(sumsq)

        # --- cos_theta = <x_hat, w_hat> on the MXU, clamp to [-1, 1] -------------
        cos_t = jnp.dot(xn.astype(wnt.dtype), wnt,
                        preferred_element_type=jnp.float32)       # (bb, tile_c) f32
        cos_t = jnp.clip(cos_t, -1.0, 1.0)

        # --- cos(m*theta), k = floor(m*theta/pi), (-1)^k (threshold count) -------
        cos_mt = _MLAMBDA[m](cos_t)
        k = jnp.zeros_like(cos_t)
        sign = jnp.ones_like(cos_t)
        for th in thresholds:
            hit = cos_t <= th
            k = k + jnp.where(hit, 1.0, 0.0)
            sign = jnp.where(hit, -sign, sign)                    # running (-1)^k
        phi = sign * cos_mt - 2.0 * k

        # --- one_hot(label), offset by the C-tile index (replaces scatter_) ------
        bb, cc = cos_t.shape
        col = (jax.lax.broadcasted_iota(jnp.int32, (bb, cc), 1)
               + pl.program_id(0) * tile_c)
        one_hot = jnp.where(col == lbl, 1.0, 0.0)

        out = one_hot * (phi - cos_t) * inv_1p_lamb + cos_t
        out_ref[...] = (out * norm_x).astype(out_ref.dtype)       # scale by ||x||

    return kernel


def sphere_product_forward(x, weight, label, *, m=4, iteration=1,
                           weight_dtype=jnp.float32,
                           max_block_b=512, max_tile_c=512, eps=1e-12):
    """Pallas forward of SphereProduct.forward(input, label).

    x:      (B, in_features)   f32
    weight: (out_features, in_features)  f32  (PyTorch layout)
    label:  (B,) int
    """
    B, D = x.shape
    C, D2 = weight.shape
    assert D == D2, (D, D2)

    # TODO(synk): self.iter is host-side Python state in the PyTorch module; the
    # lambda annealing schedule is evaluated here in the wrapper from `iteration`.
    lamb = max(5.0, 1000.0 * (1.0 + 0.12 * iteration) ** (-1.0))

    # ---- Hoisted, batch-invariant weight prep: normalize along dim=1 while still
    # (C, D) (lane-axis reduce), transpose once, optional bf16 storage for the MXU.
    w_norm = jnp.sqrt(jnp.sum(weight.astype(jnp.float32) ** 2, axis=1, keepdims=True))
    wnt = (weight / jnp.maximum(w_norm, eps)).T.astype(weight_dtype)      # (D, C)

    # ---- Tiling choices --------------------------------------------------------
    block_b = _pick_block_b(B, max_block_b)
    num_b = pl.cdiv(B, block_b)
    b_pad = num_b * block_b

    if C <= max_tile_c:
        tile_c, num_c, c_pad = C, 1, C          # single lane-dense C tile
    else:
        tile_c = max_tile_c
        assert tile_c % 128 == 0, "C tile must be a multiple of 128 lanes"
        num_c = pl.cdiv(C, tile_c)
        c_pad = num_c * tile_c

    # ---- Ragged batch / class padding (sliced off after the call) ---------------
    x_p = jnp.pad(x.astype(jnp.float32), ((0, b_pad - B), (0, 0)))
    lbl_p = jnp.pad(label.astype(jnp.int32), ((0, b_pad - B),)).reshape(b_pad, 1)
    wnt_p = jnp.pad(wnt, ((0, 0), (0, c_pad - C)))

    # ---- Weight spec: whole-array resident in VMEM when it fits (single copy, no
    # double buffer); otherwise (large C) a (D, tile_c) block indexed by the OUTER
    # C axis so it is DMA'd once per C tile and reused across all batch steps.
    if num_c == 1:
        w_spec = pl.BlockSpec(memory_space=pltpu.MemorySpace.VMEM)
    else:
        w_spec = pl.BlockSpec((D, tile_c), lambda c, b: (0, c))

    # ---- Explicit VMEM budget (valid on v7x's 64 MiB as well as v5e/v6e) --------
    w_item = jnp.dtype(weight_dtype).itemsize
    est = (2 * block_b * D * 4                      # x (double-buffered)
           + 2 * block_b * 4                        # labels
           + 2 * block_b * tile_c * 4               # output (double-buffered)
           + (1 if num_c == 1 else 2) * D * tile_c * w_item
           + 8 * block_b * tile_c * 4)              # epilogue live temporaries
    vmem_limit = int(min(64 * 1024 * 1024, max(32 * 1024 * 1024, 2 * est)))

    cost = pl.CostEstimate(
        flops=2 * b_pad * D * c_pad + 24 * b_pad * c_pad,
        transcendentals=b_pad,
        bytes_accessed=(x_p.size * 4 + wnt_p.size * w_item
                        + lbl_p.size * 4 + b_pad * c_pad * 4))

    kernel = _make_sphere_kernel(m, float(lamb), eps, tile_c)

    out = pl.pallas_call(
        kernel,
        out_shape=jax.ShapeDtypeStruct((b_pad, c_pad), jnp.float32),
        grid=(num_c, num_b),                         # C outer, batch inner
        in_specs=[
            pl.BlockSpec((block_b, D), lambda c, b: (b, 0)),   # x batch block
            w_spec,                                            # normalized weight.T
            pl.BlockSpec((block_b, 1), lambda c, b: (b, 0)),   # labels
        ],
        out_specs=pl.BlockSpec((block_b, tile_c), lambda c, b: (b, c)),
        compiler_params=pltpu.CompilerParams(
            dimension_semantics=("parallel", "parallel"),
            vmem_limit_bytes=vmem_limit),
        cost_estimate=cost,
    )(x_p, wnt_p, lbl_p)

    return out[:B, :C]


# ---------------------------------------------------------------------------
# Pure-JAX reference following the PyTorch code literally (acos / floor path)
# ---------------------------------------------------------------------------

def sphere_product_ref(x, weight, label, *, m=4, iteration=1):
    lamb = max(5.0, 1000.0 * (1.0 + 0.12 * iteration) ** (-1.0))
    eps = 1e-12
    norm_x = jnp.linalg.norm(x, axis=1, keepdims=True)
    xn = x / jnp.maximum(norm_x, eps)
    wn = weight / jnp.maximum(jnp.linalg.norm(weight, axis=1, keepdims=True), eps)
    cos_theta = jnp.clip(
        jnp.dot(xn, wn.T, precision=jax.lax.Precision.HIGHEST), -1.0, 1.0)
    cos_m_theta = _MLAMBDA[m](cos_theta)
    theta = jnp.arccos(cos_theta)
    k = jnp.floor(m * theta / _PI_T)
    sign = jnp.where(jnp.mod(k, 2.0) == 0.0, 1.0, -1.0)      # (-1)**k, k integer-valued
    phi_theta = sign * cos_m_theta - 2.0 * k
    one_hot = jax.nn.one_hot(label, weight.shape[0], dtype=jnp.float32)
    out = one_hot * (phi_theta - cos_theta) / (1.0 + lamb) + cos_theta
    return out * norm_x


# ---------------------------------------------------------------------------

if __name__ == "__main__":
    key = jax.random.PRNGKey(0)
    kx, kw, kl, kx2, kw2, kl2 = jax.random.split(key, 6)

    # ---- Test 1: f32, single C tile (whole normalized weight resident in VMEM) --
    B, D, C = 64, 64, 128
    x = jax.random.normal(kx, (B, D), jnp.float32)
    bound = math.sqrt(6.0 / (D + C))                          # xavier_uniform
    weight = jax.random.uniform(kw, (C, D), jnp.float32, -bound, bound)
    label = jax.random.randint(kl, (B,), 0, C, jnp.int32)

    out = jax.block_until_ready(
        sphere_product_forward(x, weight, label, m=4, iteration=1))
    ref = jax.block_until_ready(sphere_product_ref(x, weight, label, m=4, iteration=1))

    assert out.shape == (B, C), out.shape
    assert bool(jnp.all(jnp.isfinite(out))), "non-finite output (test 1)"
    max_err = float(jnp.max(jnp.abs(out - ref)))
    rel_err = float(jnp.linalg.norm(out - ref) / (jnp.linalg.norm(ref) + 1e-12))
    assert max_err < 5e-2, f"test 1 max abs err {max_err}"
    assert rel_err < 1e-2, f"test 1 rel fro err {rel_err}"

    # ---- Test 2: bf16 weights/activations on the MXU, C tiling (2 C tiles, iota
    # offset path), ragged batch padded in the wrapper ----------------------------
    B2, D2, C2 = 60, 64, 256
    x2 = jax.random.normal(kx2, (B2, D2), jnp.float32)
    bound2 = math.sqrt(6.0 / (D2 + C2))
    weight2 = jax.random.uniform(kw2, (C2, D2), jnp.float32, -bound2, bound2)
    label2 = jax.random.randint(kl2, (B2,), 0, C2, jnp.int32)

    out2 = jax.block_until_ready(
        sphere_product_forward(x2, weight2, label2, m=4, iteration=1,
                               weight_dtype=jnp.bfloat16, max_tile_c=128))
    ref2 = jax.block_until_ready(
        sphere_product_ref(x2, weight2, label2, m=4, iteration=1))

    assert out2.shape == (B2, C2), out2.shape
    assert bool(jnp.all(jnp.isfinite(out2))), "non-finite output (test 2)"
    max_err2 = float(jnp.max(jnp.abs(out2 - ref2)))
    rel_err2 = float(jnp.linalg.norm(out2 - ref2) / (jnp.linalg.norm(ref2) + 1e-12))
    assert max_err2 < 2e-1, f"test 2 (bf16) max abs err {max_err2}"
    assert rel_err2 < 5e-2, f"test 2 (bf16) rel fro err {rel_err2}"

    print("KERNEL_OK")
</pallas_src>

<mosaic_0001>
module attributes {stable_mosaic.version = 11 : i64} {
  func.func @kernel(%arg0: i32, %arg1: i32, %arg2: memref<64x64xf32, #tpu.memory_space<vmem>>, %arg3: memref<64x128xf32, #tpu.memory_space<vmem>>, %arg4: memref<64x1xi32, #tpu.memory_space<vmem>>, %arg5: memref<64x128xf32, #tpu.memory_space<vmem>>) attributes {dimension_semantics = [#tpu.dimension_semantics<parallel>, #tpu.dimension_semantics<parallel>], iteration_bounds = array<i64: 1, 1>, scalar_prefetch = 0 : i64, scratch_operands = 0 : i64, tpu.core_type = #tpu.core_type<tc>, window_params = [{transform_indices = @transform_0, window_bounds = array<i64: 64, 64>}, {pipeline_mode = #tpu.pipeline_mode<synchronous>, transform_indices = @transform_1, window_bounds = array<i64: 64, 128>}, {transform_indices = @transform_2, window_bounds = array<i64: 64, 1>}, {transform_indices = @transform_3, window_bounds = array<i64: 64, 128>}]} {
    %c0 = arith.constant 0 : index
    %c0_0 = arith.constant 0 : index
    %0 = vector.load %arg2[%c0, %c0_0] : memref<64x64xf32, #tpu.memory_space<vmem>>, vector<64x64xf32>
    %c0_1 = arith.constant 0 : index
    %c0_2 = arith.constant 0 : index
    %1 = vector.load %arg4[%c0_1, %c0_2] : memref<64x1xi32, #tpu.memory_space<vmem>>, vector<64x1xi32>
    %c0_3 = arith.constant 0 : index
    %c0_4 = arith.constant 0 : index
    %2 = vector.load %arg3[%c0_3, %c0_4] : memref<64x128xf32, #tpu.memory_space<vmem>>, vector<64x128xf32>
    %3 = arith.mulf %0, %0 : vector<64x64xf32>
    %cst = arith.constant dense<0.000000e+00> : vector<64xf32>
    %4 = vector.multi_reduction <add>, %3, %cst [1] : vector<64x64xf32> to vector<64xf32>
    %5 = vector.shape_cast %4 : vector<64xf32> to vector<64x1xf32>
    %cst_5 = arith.constant 1.000000e-24 : f32
    %6 = vector.broadcast %cst_5 : f32 to vector<64x1xf32>
    %7 = arith.maximumf %5, %6 : vector<64x1xf32>
    %8 = math.rsqrt %7 : vector<64x1xf32>
    %9 = vector.broadcast %8 : vector<64x1xf32> to vector<64x64xf32>
    %10 = arith.mulf %0, %9 : vector<64x64xf32>
    %11 = arith.mulf %5, %8 : vector<64x1xf32>
    %cst_6 = arith.constant dense<0.000000e+00> : vector<64x128xf32>
    %12 = tpu.matmul %10, %2, %cst_6 {dimension_numbers = #tpu.dot_dimension_numbers<[1], [0], [0], [1], [0, 0, 1, 1], [], []>} : vector<64x64xf32>, vector<64x128xf32>, vector<64x128xf32> -> vector<64x128xf32>
    %cst_7 = arith.constant -1.000000e+00 : f32
    %cst_8 = arith.constant 1.000000e+00 : f32
    %13 = vector.broadcast %cst_7 : f32 to vector<64x128xf32>
    %14 = arith.maximumf %13, %12 : vector<64x128xf32>
    %15 = vector.broadcast %cst_8 : f32 to vector<64x128xf32>
    %16 = arith.minimumf %15, %14 : vector<64x128xf32>
    %17 = arith.mulf %16, %16 : vector<64x128xf32>
    %cst_9 = arith.constant 8.000000e+00 : f32
    %18 = vector.broadcast %cst_9 : f32 to vector<64x128xf32>
    %19 = arith.mulf %18, %17 : vector<64x128xf32>
    %20 = arith.mulf %16, %16 : vector<64x128xf32>
    %21 = arith.mulf %19, %20 : vector<64x128xf32>
    %22 = arith.mulf %16, %16 : vector<64x128xf32>
    %cst_10 = arith.constant 8.000000e+00 : f32
    %23 = vector.broadcast %cst_10 : f32 to vector<64x128xf32>
    %24 = arith.mulf %23, %22 : vector<64x128xf32>
    %25 = arith.subf %21, %24 : vector<64x128xf32>
    %cst_11 = arith.constant 1.000000e+00 : f32
    %26 = vector.broadcast %cst_11 : f32 to vector<64x128xf32>
    %27 = arith.addf %25, %26 : vector<64x128xf32>
    %cst_12 = arith.constant 0.000000e+00 : f32
    %28 = vector.broadcast %cst_12 : f32 to vector<64x128xf32>
    %cst_13 = arith.constant 1.000000e+00 : f32
    %29 = vector.broadcast %cst_13 : f32 to vector<64x128xf32>
    %cst_14 = arith.constant 0.707106769 : f32
    %30 = vector.broadcast %cst_14 : f32 to vector<64x128xf32>
    %31 = arith.cmpf ole, %16, %30 : vector<64x128xf32>
    %cst_15 = arith.constant 1.000000e+00 : f32
    %cst_16 = arith.constant 0.000000e+00 : f32
    %32 = vector.broadcast %cst_15 : f32 to vector<64x128xf32>
    %33 = vector.broadcast %cst_16 : f32 to vector<64x128xf32>
    %34 = arith.select %31, %32, %33 : vector<64x128xi1>, vector<64x128xf32>
    %35 = arith.addf %28, %34 : vector<64x128xf32>
    %cst_17 = arith.constant 0.000000e+00 : f32
    %36 = vector.broadcast %cst_17 : f32 to vector<64x128xf32>
    %37 = arith.subf %36, %29 : vector<64x128xf32>
    %38 = arith.select %31, %37, %29 : vector<64x128xi1>, vector<64x128xf32>
    %cst_18 = arith.constant 1.79489656E-9 : f32
    %39 = vector.broadcast %cst_18 : f32 to vector<64x128xf32>
    %40 = arith.cmpf ole, %16, %39 : vector<64x128xf32>
    %cst_19 = arith.constant 1.000000e+00 : f32
    %cst_20 = arith.constant 0.000000e+00 : f32
    %41 = vector.broadcast %cst_19 : f32 to vector<64x128xf32>
    %42 = vector.broadcast %cst_20 : f32 to vector<64x128xf32>
    %43 = arith.select %40, %41, %42 : vector<64x128xi1>, vector<64x128xf32>
    %44 = arith.addf %35, %43 : vector<64x128xf32>
    %cst_21 = arith.constant 0.000000e+00 : f32
    %45 = vector.broadcast %cst_21 : f32 to vector<64x128xf32>
    %46 = arith.subf %45, %38 : vector<64x128xf32>
    %47 = arith.select %40, %46, %38 : vector<64x128xi1>, vector<64x128xf32>
    %cst_22 = arith.constant -0.707106769 : f32
    %48 = vector.broadcast %cst_22 : f32 to vector<64x128xf32>
    %49 = arith.cmpf ole, %16, %48 : vector<64x128xf32>
    %cst_23 = arith.constant 1.000000e+00 : f32
    %cst_24 = arith.constant 0.000000e+00 : f32
    %50 = vector.broadcast %cst_23 : f32 to vector<64x128xf32>
    %51 = vector.broadcast %cst_24 : f32 to vector<64x128xf32>
    %52 = arith.select %49, %50, %51 : vector<64x128xi1>, vector<64x128xf32>
    %53 = arith.addf %44, %52 : vector<64x128xf32>
    %cst_25 = arith.constant 0.000000e+00 : f32
    %54 = vector.broadcast %cst_25 : f32 to vector<64x128xf32>
    %55 = arith.subf %54, %47 : vector<64x128xf32>
    %56 = arith.select %49, %55, %47 : vector<64x128xi1>, vector<64x128xf32>
    %cst_26 = arith.constant -1.000000e+00 : f32
    %57 = vector.broadcast %cst_26 : f32 to vector<64x128xf32>
    %58 = arith.cmpf ole, %16, %57 : vector<64x128xf32>
    %cst_27 = arith.constant 1.000000e+00 : f32
    %cst_28 = arith.constant 0.000000e+00 : f32
    %59 = vector.broadcast %cst_27 : f32 to vector<64x128xf32>
    %60 = vector.broadcast %cst_28 : f32 to vector<64x128xf32>
    %61 = arith.select %58, %59, %60 : vector<64x128xi1>, vector<64x128xf32>
    %62 = arith.addf %53, %61 : vector<64x128xf32>
    %cst_29 = arith.constant 0.000000e+00 : f32
    %63 = vector.broadcast %cst_29 : f32 to vector<64x128xf32>
    %64 = arith.subf %63, %56 : vector<64x128xf32>
    %65 = arith.select %58, %64, %56 : vector<64x128xi1>, vector<64x128xf32>
    %66 = arith.mulf %65, %27 : vector<64x128xf32>
    %cst_30 = arith.constant 2.000000e+00 : f32
    %67 = vector.broadcast %cst_30 : f32 to vector<64x128xf32>
    %68 = arith.mulf %67, %62 : vector<64x128xf32>
    %69 = arith.subf %66, %68 : vector<64x128xf32>
    %70 = tpu.iota {dimensions = array<i32: 1>} : vector<64x128xi32>
    %c128_i32 = arith.constant 128 : i32
    %71 = arith.muli %arg0, %c128_i32 : i32
    %72 = vector.broadcast %71 : i32 to vector<64x128xi32>
    %73 = arith.addi %70, %72 : vector<64x128xi32>
    %74 = vector.broadcast %1 : vector<64x1xi32> to vector<64x128xi32>
    %75 = arith.cmpi eq, %73, %74 : vector<64x128xi32>
    %cst_31 = arith.constant 1.000000e+00 : f32
    %cst_32 = arith.constant 0.000000e+00 : f32
    %76 = vector.broadcast %cst_31 : f32 to vector<64x128xf32>
    %77 = vector.broadcast %cst_32 : f32 to vector<64x128xf32>
    %78 = arith.select %75, %76, %77 : vector<64x128xi1>, vector<64x128xf32>
    %79 = arith.subf %69, %16 : vector<64x128xf32>
    %80 = arith.mulf %78, %79 : vector<64x128xf32>
    %cst_33 = arith.constant 0.00111874705 : f32
    %81 = vector.broadcast %cst_33 : f32 to vector<64x128xf32>
    %82 = arith.mulf %80, %81 : vector<64x128xf32>
    %83 = arith.addf %82, %16 : vector<64x128xf32>
    %84 = vector.broadcast %11 : vector<64x1xf32> to vector<64x128xf32>
    %85 = arith.mulf %83, %84 : vector<64x128xf32>
    %c0_34 = arith.constant 0 : index
    %c0_35 = arith.constant 0 : index
    %86 = vector.load %arg5[%c0_34, %c0_35] : memref<64x128xf32, #tpu.memory_space<vmem>>, vector<64x128xf32>
    tpu.vector_store %arg5[%c0_34, %c0_35], %85 {strides = array<i32>} : memref<64x128xf32, #tpu.memory_space<vmem>>, vector<64x128xf32>,
    return
  }
  func.func @transform_0(%arg0: i32, %arg1: i32) -> (i32, i32) {
    %c0_i32 = arith.constant 0 : i32
    %c0_i32_0 = arith.constant 0 : i32
    return %arg1, %c0_i32 : i32, i32
  }
  func.func @transform_1(%arg0: i32, %arg1: i32) -> (i32, i32) {
    %c0_i32 = arith.constant 0 : i32
    %c0_i32_0 = arith.constant 0 : i32
    %c0_i32_1 = arith.constant 0 : i32
    return %c0_i32, %c0_i32_0 : i32, i32
  }
  func.func @transform_2(%arg0: i32, %arg1: i32) -> (i32, i32) {
    %c0_i32 = arith.constant 0 : i32
    %c0_i32_0 = arith.constant 0 : i32
    return %arg1, %c0_i32 : i32, i32
  }
  func.func @transform_3(%arg0: i32, %arg1: i32) -> (i32, i32) {
    %c0_i32 = arith.constant 0 : i32
    return %arg1, %arg0 : i32, i32
  }
}

</mosaic_0001>

<bundles_post_ra>
// kernel: tpu_custom_call.1
= control target key start
LH: loop header
LB: loop body
LE: loop exit
PB: predicated region body
PF: predicated region fallthrough
CT: control target
= control target key end

     0   :  { %8 = vsyncpa [#allocation3], 0  ;;  %s1158_s0 = inlined_call_operand.vmem [shape: f32[64,64], index: 0, kind: input, shape index: {}]   ;;  %s1159_s1 = inlined_call_operand.hbm [shape: f32[64,128], index: 1, kind: input, shape index: {}]   ;;  %s1160_s2 = inlined_call_operand.vmem [shape: s32[64,1], index: 2, kind: input, shape index: {}]   ;;  %s1161_s3 = inlined_call_operand.hbm [shape: f32[64,128], index: 3, kind: output, shape index: {}]  }
   0x1   :  { %9 = vsyncpa [#allocation4], 0  ;;  %s734_s12 = smov [#allocation2]  }
   0x2   :  { %s17_s13 = sshll.u32 %s734_s12, 4  ;;  %s18_s13 = int_to_ptr.vmem [resolvable:$true] %s17_s13 }
   0x3   :  { %s698_s14 = scalar_lea.vmem %s18_s13, 1024  ;;  %p703_p1 = scmp.lt.s32.totalorder %s18_s13, %s18_s13 }
   0x4   :  { %p699_p0 = scmp.ne.s32.totalorder %s18_s13, %s698_s14  ;;  %p704_p2 = scmp.lt.s32.totalorder %s698_s14, %s698_s14 }
   0x6   :  { %p705_p3 = por %p704_p2, %p703_p1 }
   0x8   :  { %p706_p4 = pnand %p705_p3, %p699_p0 }
   0xa   :  { %709 = shalt.err (!%p706_p4)
}
   0xb   :  { %s735_s15 = smov 128   ;;  %s736_s16 = smov 8  }
   0xc   :  { %23 = dma.hbm_to_vmem [thread:$0]  %s1159_s1, 1024, %s18_s13, [#allocation3], %s735_s15, %s735_s15, %s736_s16  }
   0xd   :  { %730 = dma.done.wait [#allocation3], 1024  }
   0xe   :  { %731 = vsyncadd [#allocation3], 4294966272  ;;  %v770_v0 = vld [vmem:[%s1158_s0 + $0x8] sm:$0xff]  ;;  %vm61_vm0 = vcmask 523264   ;;  %v775_v1 = vld [vmem:[%s1158_s0] sm:$0xff]  ;;  %v737_v33 = vmov 0  }
   0xf   :  { %v780_v2 = vld [vmem:[%s1158_s0 + $0x28] sm:$0xff]  ;;  %v54_v3 = vmul.f32 %v770_v0, %v770_v0  ;;  %v53_v4 = vmul.f32 %v775_v1, %v775_v1  ;;  %v791_v6 = vld [vmem:[%s1158_s0 + $0x20] sm:$0xff]  ;;  %v798_v8 = vld [vmem:[%s1158_s0 + $0x30] sm:$0xff]  ;;  %673 = vset.pattern.permute.xlu1 %v737_v33  ;;  %672 = vset.pattern.permute.xlu0 %v737_v33 }
  0x10   :  { %v58_v5 = vmul.f32 %v780_v2, %v780_v2  ;;  %v57_v7 = vmul.f32 %v791_v6, %v791_v6  ;;  %v803_v9 = vld [vmem:[%s1158_s0 + $0x10] sm:$0xff]  ;;  %v59_v14 = vmul.f32 %v798_v8, %v798_v8  ;;  %v816_v16 = vld [vmem:[%s1158_s0 + $0x38] sm:$0xff]  ;;  %v50_v26 = vld [vmem:[#allocation2 + $0x28] sm:$0xff] }
  0x11   :  { %v65_v10 = vsel %vm61_vm0, %v54_v3, 0.0  ;;  %v62_v11 = vsel %vm61_vm0, %v53_v4, 0.0  ;;  %v55_v15 = vmul.f32 %v803_v9, %v803_v9  ;;  %v821_v17 = vld [vmem:[%s1158_s0 + $0x18] sm:$0xff]  ;;  %v60_v20 = vmul.f32 %v816_v16, %v816_v16  ;;  %v51_v25 = vld [vmem:[#allocation2 + $0x30] sm:$0xff]  ;;  %v49_v27 = vld [vmem:[#allocation2 + $0x20] sm:$0xff] }
  0x12   :  { %66 = vadd.xlane.f32.xlu1 %v65_v10  ;;  %63 = vadd.xlane.f32.xlu0 %v62_v11  ;;  %v77_v12 = vsel %vm61_vm0, %v58_v5, 0.0  ;;  %v74_v13 = vsel %vm61_vm0, %v57_v7, 0.0  ;;  %v80_v18 = vsel %vm61_vm0, %v59_v14, 0.0  ;;  %v56_v21 = vmul.f32 %v821_v17, %v821_v17  ;;  %v52_v24 = vld [vmem:[#allocation2 + $0x38] sm:$0xff]  ;;  %v47_v29 = vld [vmem:[#allocation2 + $0x10] sm:$0xff]  ;;  %v46_v30 = vld [vmem:[#allocation2 + $0x8] sm:$0xff] }
  0x13   :  { %v68_v19 = vsel %vm61_vm0, %v55_v15, 0.0  ;;  %v83_v22 = vsel %vm61_vm0, %v60_v20, 0.0  ;;  %621 = vmatprep.subr.mxu0 %v52_v24  ;;  %649 = vmatprep.subr.mxu1 %v52_v24  ;;  %v48_v28 = vld [vmem:[#allocation2 + $0x18] sm:$0xff]  ;;  %v45_v31 = vld [vmem:[#allocation2] sm:$0xff]  ;;  %v38_v32 = vld [vmem:[%s1160_s2 + $0x8] sm:$0xff] }
  0x14   :  { %v71_v23 = vsel %vm61_vm0, %v56_v21, 0.0  ;;  %622 = vmatpush3.msra.mxu0 %v52_v24  ;;  %657 = vmatpush3.msra.mxu1 %v52_v24  ;;  %v37_v34 = vld [vmem:[%s1160_s2] sm:$0xff]  ;;  %v39_v35 = vld [vmem:[%s1160_s2 + $0x10] sm:$0xff]  ;;  %v40_v36 = vld [vmem:[%s1160_s2 + $0x18] sm:$0xff] }
  0x15   :  { %623 = vmatprep.subr.mxu0 %v51_v25  ;;  %650 = vmatprep.subr.mxu1 %v51_v25  ;;  %v41_v37 = vld [vmem:[%s1160_s2 + $0x20] sm:$0xff]  ;;  %v42_v38 = vld [vmem:[%s1160_s2 + $0x28] sm:$0xff]  ;;  %v43_v39 = vld [vmem:[%s1160_s2 + $0x30] sm:$0xff] }
  0x16   :  { %78 = vadd.xlane.f32.xlu1 %v77_v12  ;;  %75 = vadd.xlane.f32.xlu0 %v74_v13  ;;  %v44_v40 = vld [vmem:[%s1160_s2 + $0x38] sm:$0xff]  ;;  %s740_s2 = smov [#allocation5]  }
  0x17   :  { %624 = vmatpush3.msra.mxu0 %v51_v25  ;;  %658 = vmatpush3.msra.mxu1 %v51_v25  ;;  %s577_s24 = sshll.u32 %s740_s2, 4  ;;  %s578_s24 = int_to_ptr.vmem [resolvable:$true] %s577_s24 }
  0x18   :  { %625 = vmatprep.subr.mxu0 %v50_v26  ;;  %651 = vmatprep.subr.mxu1 %v50_v26  ;;  %s710_s1 = scalar_lea.vmem %s578_s24, 1024  ;;  %p715_p6 = scmp.lt.s32.totalorder %s578_s24, %s578_s24 }
  0x19   :  { %626 = vmatpush3.msra.mxu0 %v50_v26  ;;  %659 = vmatpush3.msra.mxu1 %v50_v26  ;;  %p711_p5 = scmp.ne.s32.totalorder %s578_s24, %s710_s1  ;;  %p716_p7 = scmp.lt.s32.totalorder %s710_s1, %s710_s1 }
  0x1a   :  { %81 = vadd.xlane.f32.xlu1 %v80_v18  ;;  %69 = vadd.xlane.f32.xlu0 %v68_v19 }
  0x1b   :  { %627 = vmatprep.subr.mxu0 %v49_v27  ;;  %652 = vmatprep.subr.mxu1 %v49_v27  ;;  %p717_p8 = por %p716_p7, %p715_p6 }
  0x1c   :  { %628 = vmatpush3.msra.mxu0 %v49_v27  ;;  %660 = vmatpush3.msra.mxu1 %v49_v27  ;;  %v738_v27 = vmov 0.0  }
  0x1d   :  { %629 = vmatprep.subr.mxu0 %v48_v28  ;;  %653 = vmatprep.subr.mxu1 %v48_v28  ;;  %p718_p9 = pnand %p717_p8, %p711_p5 }
  0x1e   :  { %84 = vadd.xlane.f32.xlu1 %v83_v22  ;;  %72 = vadd.xlane.f32.xlu0 %v71_v23  ;;  %v479_v23 = vlaneseq }
  0x1f   :  { %630 = vmatpush3.msra.mxu0 %v48_v28  ;;  %661 = vmatpush3.msra.mxu1 %v48_v28 }
  0x20   :  { %631 = vmatprep.subr.mxu0 %v47_v29  ;;  %654 = vmatprep.subr.mxu1 %v47_v29  ;;  %v887_v25 = vand.u32 127, %v479_v23 }
  0x21   :  { %632 = vmatpush3.msra.mxu0 %v47_v29  ;;  %662 = vmatpush3.msra.mxu1 %v47_v29 }
  0x22   :  { %633 = vmatprep.subr.mxu0 %v46_v30  ;;  %655 = vmatprep.subr.mxu1 %v46_v30 }
  0x23   :  { %634 = vmatpush3.msra.mxu0 %v46_v30  ;;  %663 = vmatpush3.msra.mxu1 %v46_v30 }
  0x24   :  { %635 = vmatprep.subr.mxu0 %v45_v31  ;;  %656 = vmatprep.subr.mxu1 %v45_v31 }
  0x25   :  { %636 = vmatpush3.msra.mxu0 %v45_v31  ;;  %664 = vmatpush3.msra.mxu1 %v45_v31 }
  0x2f   :  { %488 = vperm.xlu1 %673, %v38_v32  }
  0x33   :  { %491 = vperm.xlu1 %673, %v39_v35  }
  0x34   :  { %485 = vperm.xlu0 %672, %v37_v34  }
  0x37   :  { %494 = vperm.xlu1 %673, %v40_v36   ;;  %v739_v36 = vmov 1.0  }
  0x3b   :  { %497 = vperm.xlu1 %673, %v41_v37  }
  0x3f   :  { %500 = vperm.xlu1 %673, %v42_v38  }
  0x43   :  { %503 = vperm.xlu1 %673, %v43_v39  }
  0x47   :  { %506 = vperm.xlu1 %673, %v44_v40  }
  0x9b   :  { %v67_v41 = vpop.xlane.xlu1 %66  ;;  %v64_v42 = vpop.xlane.xlu0 %63 }
  0x9c   :  { %v87_v43 = vmax.f32 %v67_v41, 1e-24  ;;  %v86_v44 = vmax.f32 %v64_v42, 1e-24 }
  0x9e   :  { %674 = vrsqrt.f32 %v87_v43 }
  0x9f   :  { %676 = vrsqrt.f32 %v86_v44  ;;  %v79_v45 = vpop.xlane.xlu1 %78  ;;  %v76_v46 = vpop.xlane.xlu0 %75 }
  0xa0   :  { %v91_v47 = vmax.f32 %v79_v45, 1e-24  ;;  %v90_v48 = vmax.f32 %v76_v46, 1e-24 }
  0xa2   :  { %678 = vrsqrt.f32 %v91_v47 }
  0xa3   :  { %680 = vrsqrt.f32 %v90_v48  ;;  %v82_v49 = vpop.xlane.xlu1 %81  ;;  %v70_v50 = vpop.xlane.xlu0 %69 }
  0xa4   :  { %v92_v51 = vmax.f32 %v82_v49, 1e-24  ;;  %v88_v52 = vmax.f32 %v70_v50, 1e-24 }
  0xa6   :  { %682 = vrsqrt.f32 %v92_v51 }
  0xa7   :  { %684 = vrsqrt.f32 %v88_v52  ;;  %v85_v53 = vpop.xlane.xlu1 %84  ;;  %v73_v54 = vpop.xlane.xlu0 %72 }
  0xa8   :  { %v93_v55 = vmax.f32 %v85_v53, 1e-24  ;;  %v89_v56 = vmax.f32 %v73_v54, 1e-24 }
  0xaa   :  { %686 = vrsqrt.f32 %v93_v55 }
  0xab   :  { %v675_v57 = vpop.eup %674  ;;  %688 = vrsqrt.f32 %v89_v56 }
  0xac   :  { %v677_v58 = vpop.eup %676  ;;  %v855_v59 = vmul.f32 %v675_v57, %v67_v41  ;;  %v103_v60 = vmul.f32 %v675_v57, %v770_v0 }
  0xad   :  { %v858_v61 = vmul.f32 %v677_v58, %v64_v42  ;;  %v102_v62 = vmul.f32 %v677_v58, %v775_v1 }
  0xaf   :  { %v679_v63 = vpop.eup %678  ;;  %637 = vmatprep.mubr.msk.f32.mxu0 %vm61_vm0, %v102_v62 }
  0xb0   :  { %v681_v3 = vpop.eup %680  ;;  %v862_v4 = vmul.f32 %v679_v63, %v79_v45  ;;  %638 = vmatmul.mubr.msk.f32.vlgmr.msra.gmra.mxu0 %vm61_vm0, %v103_v60  ;;  %v107_v5 = vmul.f32 %v679_v63, %v780_v2 }
  0xb1   :  { %v866_v7 = vmul.f32 %v681_v3, %v76_v46  ;;  %v106_v10 = vmul.f32 %v681_v3, %v791_v6 }
  0xb3   :  { %v683_v11 = vpop.eup %682  ;;  %643 = vmatprep.mubr.msk.f32.mxu1 %vm61_vm0, %v106_v10 }
  0xb4   :  { %v685_v0 = vpop.eup %684  ;;  %v870_v12 = vmul.f32 %v683_v11, %v82_v49  ;;  %644 = vmatmul.mubr.msk.f32.vlgmr.msra.gmra.mxu1 %vm61_vm0, %v107_v5  ;;  %v108_v1 = vmul.f32 %v683_v11, %v798_v8  ;;  %v489_v8 = vpop.permute.xlu1 %488 }
  0xb5   :  { %v874_v13 = vmul.f32 %v685_v0, %v70_v50  ;;  %v104_v14 = vmul.f32 %v685_v0, %v803_v9  ;;  %vm509_vm1 = vcmp.eq.s32.totalorder %v887_v25, %v489_v8 }
  0xb6   :  { %646 = vmatprep.mubr.msk.f32.mxu1 %vm61_vm0, %v108_v1  ;;  %v896_v28 = vsel %vm509_vm1, 1.0, %v738_v27 }
  0xb7   :  { %v687_v2 = vpop.eup %686  ;;  %640 = vmatprep.mubr.msk.f32.mxu0 %vm61_vm0, %v104_v14 }
  0xb8   :  { %v689_v6 = vpop.eup %688  ;;  %v879_v15 = vmul.f32 %v687_v2, %v85_v53  ;;  %v109_v18 = vmul.f32 %v687_v2, %v816_v16  ;;  %v492_v20 = vpop.permute.xlu1 %491 }
  0xb9   :  { %v105_v19 = vmul.f32 %v689_v6, %v821_v17  ;;  %vm510_vm2 = vcmp.eq.s32.totalorder %v887_v25, %v492_v20  ;;  %v893_v17 = vmul.f32 %v689_v6, %v73_v54 }
  0xba   :  { %647 = vmatmul.mubr.msk.f32.gmra.mxu1 %vm61_vm0, %v109_v18  ;;  %v902_v30 = vsel %vm510_vm2, 1.0, %v738_v27 }
  0xbb   :  { %641 = vmatmul.mubr.msk.f32.gmra.mxu0 %vm61_vm0, %v105_v19 }
  0xbc   :  { %v495_v21 = vpop.permute.xlu1 %494 }
  0xbd   :  { %vm511_vm3 = vcmp.eq.s32.totalorder %v887_v25, %v495_v21 }
  0xbe   :  { %v905_v31 = vsel %vm511_vm3, 1.0, %v738_v27 }
  0xc0   :  { %v498_v9 = vpop.permute.xlu1 %497 }
  0xc1   :  { %vm512_vm4 = vcmp.eq.s32.totalorder %v887_v25, %v498_v9 }
  0xc2   :  { %v908_v32 = vsel %vm512_vm4, 1.0, %v738_v27 }
  0xc4   :  { %v501_v22 = vpop.permute.xlu1 %500 }
  0xc5   :  { %vm513_vm5 = vcmp.eq.s32.totalorder %v887_v25, %v501_v22 }
  0xc6   :  { %v917_v34 = vsel %vm513_vm5, 1.0, %v738_v27 }
  0xc8   :  { %v885_v24 = vpop.permute.xlu1 %503 }
  0xcc   :  { %v507_v16 = vpop.permute.xlu1 %506 }
  0xcd   :  { %vm515_vm6 = vcmp.eq.s32.totalorder %v887_v25, %v507_v16 }
  0xce   :  { %v936_v46 = vsel %vm515_vm6, 1.0, %v738_v27 }
 0x170   :  { %v639_v26 = vpop.f32.mrf.mxu0 }
 0x171   :  { %v899_v29 = vclamps-f32 %v639_v26, 1.0 }
 0x172   :  { %v208_v9 = vpop.f32.mrf.mxu0 }
 0x173   :  { %v264_v33 = vmul.f32 %v899_v29, %v899_v29  ;;  %vm304_vm7 = vcmp.le.f32.partialorder %v899_v29, 0.70710677  ;;  %vm336_vm8 = vcmp.le.f32.partialorder %v899_v29, 1.7948966e-09  ;;  %vm376_vm9 = vcmp.le.f32.partialorder %v899_v29, -0.70710677 }
 0x174   :  { %v312_v35 = vsel %vm304_vm7, 1.0, %v738_v27  ;;  %v328_v37 = vsel %vm304_vm7, -1.0, %v739_v36  ;;  %v344_v38 = vsel %vm336_vm8, 1.0, %v738_v27  ;;  %v645_v39 = vpop.f32.mrf.mxu1  ;;  %vm416_vm10 = vcmp.le.f32.partialorder %v899_v29, -1.0 }
 0x175   :  { %v272_v40 = vmul.f32 8.0, %v264_v33  ;;  %v352_v41 = vadd.f32 %v344_v38, %v312_v35  ;;  %v360_v42 = vsub.f32 0.0, %v328_v37  ;;  %v384_v43 = vsel %vm376_vm9, 1.0, %v738_v27 }
 0x176   :  { %v424_v44 = vsel %vm416_vm10, 1.0, %v738_v27  ;;  %v931_v45 = vclamps-f32 %v645_v39, 1.0  ;;  %v228_v47 = vpop.f32.mrf.mxu1 }
 0x177   :  { %v280_v48 = vmul.f32 %v272_v40, %v264_v33  ;;  %v368_v49 = vsel %vm336_vm8, %v360_v42, %v328_v37  ;;  %v392_v50 = vadd.f32 %v384_v43, %v352_v41  ;;  %v940_v51 = vclamps-f32 %v228_v47, 1.0 }
 0x178   :  { %v400_v52 = vsub.f32 0.0, %v368_v49  ;;  %v268_v53 = vmul.f32 %v931_v45, %v931_v45  ;;  %vm308_vm11 = vcmp.le.f32.partialorder %v931_v45, 0.70710677  ;;  %vm340_vm12 = vcmp.le.f32.partialorder %v931_v45, 1.7948966e-09 }
 0x179   :  { %v288_v54 = vsub.f32 %v280_v48, %v272_v40  ;;  %v432_v55 = vadd.f32 %v424_v44, %v392_v50  ;;  %v316_v56 = vsel %vm308_vm11, 1.0, %v738_v27  ;;  %v332_v57 = vsel %vm308_vm11, -1.0, %v739_v36 }
 0x17a   :  { %v408_v58 = vsel %vm376_vm9, %v400_v52, %v368_v49  ;;  %v276_v60 = vmul.f32 8.0, %v268_v53  ;;  %v348_v62 = vsel %vm340_vm12, 1.0, %v738_v27  ;;  %v364_v63 = vsub.f32 0.0, %v332_v57 }
 0x17b   :  { %v296_v3 = vadd.f32 1.0, %v288_v54  ;;  %v440_v5 = vsub.f32 0.0, %v408_v58  ;;  %v464_v10 = vmul.f32 2.0, %v432_v55  ;;  %v356_v11 = vadd.f32 %v348_v62, %v316_v56  ;;  %v642_v40 = vpop.f32.mrf.mxu0 }
 0x17c   :  { %v284_v0 = vmul.f32 %v276_v60, %v268_v53  ;;  %v372_v1 = vsel %vm340_vm12, %v364_v63, %v332_v57  ;;  %vm380_vm13 = vcmp.le.f32.partialorder %v931_v45, -0.70710677  ;;  %vm420_vm14 = vcmp.le.f32.partialorder %v931_v45, -1.0 }
 0x17d   :  { %v448_v14 = vsel %vm416_vm10, %v440_v5, %v408_v58  ;;  %v388_v2 = vsel %vm380_vm13, 1.0, %v738_v27  ;;  %v404_v6 = vsub.f32 0.0, %v372_v1  ;;  %v428_v18 = vsel %vm420_vm14, 1.0, %v738_v27 }
 0x17e   :  { %v456_v19 = vmul.f32 %v448_v14, %v296_v3  ;;  %v292_v8 = vsub.f32 %v284_v0, %v276_v60  ;;  %v396_v20 = vadd.f32 %v388_v2, %v356_v11  ;;  %v267_v21 = vmul.f32 %v940_v51, %v940_v51  ;;  %v648_v14 = vpop.f32.mrf.mxu1 }
 0x17f   :  { %v412_v22 = vsel %vm380_vm13, %v404_v6, %v372_v1  ;;  %vm307_vm15 = vcmp.le.f32.partialorder %v940_v51, 0.70710677  ;;  %vm339_vm0 = vcmp.le.f32.partialorder %v940_v51, 1.7948966e-09  ;;  %vm379_vm1 = vcmp.le.f32.partialorder %v940_v51, -0.70710677 }
 0x180   :  { %v472_v23 = vsub.f32 %v456_v19, %v464_v10  ;;  %v300_v16 = vadd.f32 1.0, %v292_v8  ;;  %v436_v26 = vadd.f32 %v428_v18, %v396_v20  ;;  %v444_v33 = vsub.f32 0.0, %v412_v22 }
 0x181   :  { %v275_v35 = vmul.f32 8.0, %v267_v21  ;;  %v315_v37 = vsel %vm307_vm15, 1.0, %v738_v27  ;;  %v331_v38 = vsel %vm307_vm15, -1.0, %v739_v36  ;;  %v347_v39 = vsel %vm339_vm0, 1.0, %v738_v27 }
 0x182   :  { %v525_v41 = vsub.f32 %v472_v23, %v899_v29  ;;  %v452_v42 = vsel %vm420_vm14, %v444_v33, %v412_v22  ;;  %v468_v43 = vmul.f32 2.0, %v436_v26  ;;  %v355_v44 = vadd.f32 %v347_v39, %v315_v37  ;;  %v238_v37 = vpop.f32.mrf.mxu1 }
 0x183   :  { %v460_v47 = vmul.f32 %v452_v42, %v300_v16  ;;  %v283_v48 = vmul.f32 %v275_v35, %v267_v21  ;;  %v363_v49 = vsub.f32 0.0, %v331_v38  ;;  %v387_v50 = vsel %vm379_vm1, 1.0, %v738_v27 }
 0x184   :  { %v533_v52 = vmul.f32 %v525_v41, %v896_v28  ;;  %v395_v53 = vadd.f32 %v387_v50, %v355_v44  ;;  %vm419_vm2 = vcmp.le.f32.partialorder %v940_v51, -1.0  ;;  %v977_v54 = vclamps-f32 %v642_v40, 1.0 }
 0x185   :  { %v476_v55 = vsub.f32 %v460_v47, %v468_v43  ;;  %v291_v56 = vsub.f32 %v283_v48, %v275_v35  ;;  %v371_v57 = vsel %vm339_vm0, %v363_v49, %v331_v38  ;;  %v427_v58 = vsel %vm419_vm2, 1.0, %v738_v27  ;;  %v218_v35 = vpop.f32.mrf.mxu0 }
 0x186   :  { %v984_v60 = vclamps-f32 %v208_v9, 1.0  ;;  %v403_v62 = vsub.f32 0.0, %v371_v57  ;;  %v435_v63 = vadd.f32 %v427_v58, %v395_v53  ;;  %v266_v28 = vmul.f32 %v977_v54, %v977_v54 }
 0x187   :  { %v541_v3 = vmul.f32 0.001118747, %v533_v52  ;;  %v529_v5 = vsub.f32 %v476_v55, %v931_v45  ;;  %vm306_vm3 = vcmp.le.f32.partialorder %v977_v54, 0.70710677  ;;  %vm338_vm4 = vcmp.le.f32.partialorder %v977_v54, 1.7948966e-09 }
 0x188   :  { %v299_v10 = vadd.f32 1.0, %v291_v56  ;;  %v411_v11 = vsel %vm379_vm1, %v403_v62, %v371_v57  ;;  %v467_v0 = vmul.f32 2.0, %v435_v63  ;;  %v274_v1 = vmul.f32 8.0, %v266_v28 }
 0x189   :  { %v537_v2 = vmul.f32 %v529_v5, %v917_v34  ;;  %v443_v6 = vsub.f32 0.0, %v411_v11  ;;  %v314_v18 = vsel %vm306_vm3, 1.0, %v738_v27  ;;  %v330_v19 = vsel %vm306_vm3, -1.0, %v739_v36 }
 0x18a   :  { %v282_v8 = vmul.f32 %v274_v1, %v266_v28  ;;  %v346_v20 = vsel %vm338_vm4, 1.0, %v738_v27  ;;  %v362_v21 = vsub.f32 0.0, %v330_v19  ;;  %vm378_vm5 = vcmp.le.f32.partialorder %v977_v54, -0.70710677 }
 0x18b   :  { %v545_v9 = vmul.f32 0.001118747, %v537_v2  ;;  %v451_v22 = vsel %vm419_vm2, %v443_v6, %v411_v11  ;;  %v354_v23 = vadd.f32 %v346_v20, %v314_v18  ;;  %v386_v34 = vsel %vm378_vm5, 1.0, %v738_v27 }
 0x18c   :  { %v459_v16 = vmul.f32 %v451_v22, %v299_v10  ;;  %v290_v26 = vsub.f32 %v282_v8, %v274_v1  ;;  %v370_v33 = vsel %vm338_vm4, %v362_v21, %v330_v19  ;;  %vm418_vm6 = vcmp.le.f32.partialorder %v977_v54, -1.0 }
 0x18d   :  { %v1009_v38 = vadd.f32 %v899_v29, %v541_v3  ;;  %v1012_v39 = vadd.f32 %v931_v45, %v545_v9  ;;  %v394_v40 = vadd.f32 %v386_v34, %v354_v23  ;;  %v402_v41 = vsub.f32 0.0, %v370_v33 }
 0x18e   :  { %v475_v42 = vsub.f32 %v459_v16, %v467_v0  ;;  %v298_v43 = vadd.f32 1.0, %v290_v26  ;;  %v426_v44 = vsel %vm418_vm6, 1.0, %v738_v27  ;;  %v1017_v47 = vclamps-f32 %v648_v14, 1.0 }
 0x18f   :  { %v410_v48 = vsel %vm378_vm5, %v402_v41, %v370_v33  ;;  %v434_v49 = vadd.f32 %v426_v44, %v394_v40  ;;  %v1021_v50 = vclamps-f32 %v218_v35, 1.0  ;;  %v1023_v29 = vclamps-f32 %v238_v37, 1.0 }
 0x190   :  { %v528_v45 = vsub.f32 %v475_v42, %v940_v51  ;;  %v442_v52 = vsub.f32 0.0, %v410_v48  ;;  %v270_v53 = vmul.f32 %v1017_v47, %v1017_v47  ;;  %vm310_vm7 = vcmp.le.f32.partialorder %v1017_v47, 0.70710677 }
 0x191   :  { %v466_v55 = vmul.f32 2.0, %v434_v49  ;;  %v318_v56 = vsel %vm310_vm7, 1.0, %v738_v27  ;;  %v334_v57 = vsel %vm310_vm7, -1.0, %v739_v36  ;;  %vm342_vm8 = vcmp.le.f32.partialorder %v1017_v47, 1.7948966e-09 }
 0x192   :  { %v536_v58 = vmul.f32 %v528_v45, %v908_v32  ;;  %v450_v62 = vsel %vm418_vm6, %v442_v52, %v410_v48  ;;  %v278_v63 = vmul.f32 8.0, %v270_v53  ;;  %v350_v28 = vsel %vm342_vm8, 1.0, %v738_v27 }
 0x193   :  { %v458_v3 = vmul.f32 %v450_v62, %v298_v43  ;;  %v358_v5 = vadd.f32 %v350_v28, %v318_v56  ;;  %v366_v10 = vsub.f32 0.0, %v334_v57  ;;  %vm382_vm9 = vcmp.le.f32.partialorder %v1017_v47, -0.70710677 }
 0x194   :  { %v286_v11 = vmul.f32 %v278_v63, %v270_v53  ;;  %v390_v0 = vsel %vm382_vm9, 1.0, %v738_v27  ;;  %vm422_vm10 = vcmp.le.f32.partialorder %v1017_v47, -1.0  ;;  %v1043_v32 = vmul.f32 %v984_v60, %v984_v60 }
 0x195   :  { %v544_v1 = vmul.f32 0.001118747, %v536_v58  ;;  %v474_v14 = vsub.f32 %v458_v3, %v466_v55  ;;  %v374_v2 = vsel %vm342_vm8, %v366_v10, %v334_v57  ;;  %v398_v6 = vadd.f32 %v390_v0, %v358_v5 }
 0x196   :  { %v294_v18 = vsub.f32 %v286_v11, %v278_v63  ;;  %v406_v19 = vsub.f32 0.0, %v374_v2  ;;  %v430_v8 = vsel %vm422_vm10, 1.0, %v738_v27  ;;  %v265_v20 = vmul.f32 %v1021_v50, %v1021_v50 }
 0x197   :  { %v527_v21 = vsub.f32 %v474_v14, %v977_v54  ;;  %v438_v9 = vadd.f32 %v430_v8, %v398_v6  ;;  %vm305_vm11 = vcmp.le.f32.partialorder %v1021_v50, 0.70710677  ;;  %vm337_vm12 = vcmp.le.f32.partialorder %v1021_v50, 1.7948966e-09 }
 0x198   :  { %v302_v22 = vadd.f32 1.0, %v294_v18  ;;  %v414_v23 = vsel %vm382_vm9, %v406_v19, %v374_v2  ;;  %v273_v34 = vmul.f32 8.0, %v265_v20  ;;  %v313_v16 = vsel %vm305_vm11, 1.0, %v738_v27 }
 0x199   :  { %v1057_v26 = vadd.f32 %v940_v51, %v544_v1  ;;  %v535_v33 = vmul.f32 %v527_v21, %v905_v31  ;;  %v446_v35 = vsub.f32 0.0, %v414_v23  ;;  %v329_v37 = vsel %vm305_vm11, -1.0, %v739_v36 }
 0x19a   :  { %v281_v40 = vmul.f32 %v273_v34, %v265_v20  ;;  %v345_v41 = vsel %vm337_vm12, 1.0, %v738_v27  ;;  %v361_v42 = vsub.f32 0.0, %v329_v37  ;;  %vm377_vm13 = vcmp.le.f32.partialorder %v1021_v50, -0.70710677 }
 0x19b   :  { %v454_v43 = vsel %vm422_vm10, %v446_v35, %v414_v23  ;;  %v470_v44 = vmul.f32 2.0, %v438_v9  ;;  %v353_v48 = vadd.f32 %v345_v41, %v313_v16  ;;  %v385_v31 = vsel %vm377_vm13, 1.0, %v738_v27 }
 0x19c   :  { %v462_v51 = vmul.f32 %v454_v43, %v302_v22  ;;  %v289_v49 = vsub.f32 %v281_v40, %v273_v34  ;;  %v369_v45 = vsel %vm337_vm12, %v361_v42, %v329_v37  ;;  %vm417_vm14 = vcmp.le.f32.partialorder %v1021_v50, -1.0 }
 0x19d   :  { %v543_v52 = vmul.f32 0.001118747, %v535_v33  ;;  %v393_v53 = vadd.f32 %v385_v31, %v353_v48  ;;  %v401_v55 = vsub.f32 0.0, %v369_v45  ;;  %v425_v56 = vsel %vm417_vm14, 1.0, %v738_v27 }
 0x19e   :  { %v478_v57 = vsub.f32 %v462_v51, %v470_v44  ;;  %v297_v58 = vadd.f32 1.0, %v289_v49  ;;  %v269_v62 = vmul.f32 %v1023_v29, %v1023_v29  ;;  %vm309_vm15 = vcmp.le.f32.partialorder %v1023_v29, 0.70710677 }
 0x19f   :  { %v409_v63 = vsel %vm377_vm13, %v401_v55, %v369_v45  ;;  %v433_v28 = vadd.f32 %v425_v56, %v393_v53  ;;  %v317_v3 = vsel %vm309_vm15, 1.0, %v738_v27  ;;  %v333_v5 = vsel %vm309_vm15, -1.0, %v739_v36 }
 0x1a0   :  { %v531_v10 = vsub.f32 %v478_v57, %v1017_v47  ;;  %v441_v11 = vsub.f32 0.0, %v409_v63  ;;  %v277_v0 = vmul.f32 8.0, %v269_v62  ;;  %vm341_vm0 = vcmp.le.f32.partialorder %v1023_v29, 1.7948966e-09 }
 0x1a1   :  { %vm514_vm1 = vcmp.eq.s32.totalorder %v887_v25, %v885_v24  ;;  %v465_v1 = vmul.f32 2.0, %v433_v28  ;;  %v349_v14 = vsel %vm341_vm0, 1.0, %v738_v27  ;;  %v365_v2 = vsub.f32 0.0, %v333_v5 }
 0x1a2   :  { %vm381_vm2 = vcmp.le.f32.partialorder %v1023_v29, -0.70710677  ;;  %v539_v6 = vmul.f32 %v531_v10, %v936_v46  ;;  %v449_v18 = vsel %vm417_vm14, %v441_v11, %v409_v63  ;;  %v285_v19 = vmul.f32 %v277_v0, %v269_v62 }
 0x1a3   :  { %v357_v8 = vadd.f32 %v349_v14, %v317_v3  ;;  %v457_v20 = vmul.f32 %v449_v18, %v297_v58  ;;  %v373_v21 = vsel %vm341_vm0, %v365_v2, %v333_v5  ;;  %v389_v9 = vsel %vm381_vm2, 1.0, %v738_v27  ;;  %v486_v2 = vpop.permute.xlu0 %485 }
 0x1a4   :  { %vm421_vm3 = vcmp.le.f32.partialorder %v1023_v29, -1.0  ;;  %v547_v22 = vmul.f32 0.001118747, %v539_v6  ;;  %v293_v23 = vsub.f32 %v285_v19, %v277_v0  ;;  %v405_v16 = vsub.f32 0.0, %v373_v21 }
 0x1a5   :  { %v397_v34 = vadd.f32 %v389_v9, %v357_v8  ;;  %v473_v33 = vsub.f32 %v457_v20, %v465_v1  ;;  %v429_v46 = vsel %vm421_vm3, 1.0, %v738_v27  ;;  %v271_v35 = vmul.f32 8.0, %v1043_v32 }
 0x1a6   :  { %vm303_vm4 = vcmp.le.f32.partialorder %v984_v60, 0.70710677  ;;  %v551_v37 = vadd.f32 %v977_v54, %v543_v52  ;;  %v301_v40 = vadd.f32 1.0, %v293_v23  ;;  %v413_v41 = vsel %vm381_vm2, %v405_v16, %v373_v21 }
 0x1a7   :  { %v437_v42 = vadd.f32 %v429_v46, %v397_v34  ;;  %v526_v43 = vsub.f32 %v473_v33, %v1021_v50  ;;  %v445_v44 = vsub.f32 0.0, %v413_v41  ;;  %v279_v48 = vmul.f32 %v271_v35, %v1043_v32 }
 0x1a8   :  { %v311_v31 = vsel %vm303_vm4, 1.0, %v738_v27  ;;  %v555_v51 = vadd.f32 %v1017_v47, %v547_v22  ;;  %v327_v49 = vsel %vm303_vm4, -1.0, %v739_v36  ;;  %vm335_vm5 = vcmp.le.f32.partialorder %v984_v60, 1.7948966e-09 }
 0x1a9   :  { %vm375_vm6 = vcmp.le.f32.partialorder %v984_v60, -0.70710677  ;;  %v534_v54 = vmul.f32 %v526_v43, %v902_v30  ;;  %v453_v45 = vsel %vm421_vm3, %v445_v44, %v413_v41  ;;  %v469_v52 = vmul.f32 2.0, %v437_v42 }
 0x1aa   :  { %v343_v32 = vsel %vm335_vm5, 1.0, %v738_v27  ;;  %v461_v53 = vmul.f32 %v453_v45, %v301_v40  ;;  %v287_v55 = vsub.f32 %v279_v48, %v271_v35  ;;  %v359_v47 = vsub.f32 0.0, %v327_v49 }
 0x1ab   :  { %v351_v56 = vadd.f32 %v343_v32, %v311_v31  ;;  %v542_v57 = vmul.f32 0.001118747, %v534_v54  ;;  %v383_v36 = vsel %vm375_vm6, 1.0, %v738_v27  ;;  %vm415_vm7 = vcmp.le.f32.partialorder %v984_v60, -1.0 }
 0x1ac   :  { %v557_v30 = vmul.f32 %v1009_v38, %v855_v59  ;;  %v522_v58 = vsel %vm514_vm1, 1.0, %v738_v27  ;;  %v477_v62 = vsub.f32 %v461_v53, %v469_v52  ;;  %v367_v63 = vsel %vm335_vm5, %v359_v47, %v327_v49 }
 0x1ad   :  { %v391_v28 = vadd.f32 %v383_v36, %v351_v56  ;;  %v550_v3 = vadd.f32 %v1021_v50, %v542_v57  ;;  %v399_v5 = vsub.f32 0.0, %v367_v63  ;;  %v559_v10 = vmul.f32 %v551_v37, %v893_v17 }
 0x1ae   :  { %v560_v11 = vmul.f32 %v1057_v26, %v866_v7  ;;  %565 = vst [vmem:[#allocation5 + $0x8] sm:$0xff] %v557_v30  ;;  %v530_v59 = vsub.f32 %v477_v62, %v1023_v29  ;;  %v423_v24 = vsel %vm415_vm7, 1.0, %v738_v27  ;;  %v561_v38 = vmul.f32 %v1012_v39, %v862_v4 }
 0x1af   :  { %v563_v0 = vmul.f32 %v555_v51, %v879_v15  ;;  %v558_v50 = vmul.f32 %v550_v3, %v874_v13  ;;  %v295_v1 = vadd.f32 1.0, %v287_v55  ;;  %v407_v17 = vsel %vm375_vm6, %v399_v5, %v367_v63  ;;  %567 = vst [vmem:[#allocation5 + $0x18] sm:$0xff] %v559_v10 }
 0x1b0   :  { %v431_v14 = vadd.f32 %v423_v24, %v391_v28  ;;  %568 = vst [vmem:[#allocation5 + $0x20] sm:$0xff] %v560_v11  ;;  %v538_v7 = vmul.f32 %v530_v59, %v522_v58  ;;  %v439_v26 = vsub.f32 0.0, %v407_v17  ;;  %569 = vst [vmem:[#allocation5 + $0x28] sm:$0xff] %v561_v38  ;;  %vm508_vm8 = vcmp.eq.s32.totalorder %v887_v25, %v486_v2 }
 0x1b1   :  { %571 = vst [vmem:[#allocation5 + $0x38] sm:$0xff] %v563_v0  ;;  %566 = vst [vmem:[#allocation5 + $0x10] sm:$0xff] %v558_v50  ;;  %v516_v8 = vsel %vm508_vm8, 1.0, %v738_v27 }
 0x1b2   :  { %v546_v6 = vmul.f32 0.001118747, %v538_v7  ;;  %v447_v4 = vsel %vm415_vm7, %v439_v26, %v407_v17  ;;  %v463_v39 = vmul.f32 2.0, %v431_v14 }
 0x1b3   :  { %v455_v15 = vmul.f32 %v447_v4, %v295_v1 }
 0x1b4   :  { %v554_v13 = vadd.f32 %v1023_v29, %v546_v6 }
 0x1b5   :  { %v471_v18 = vsub.f32 %v455_v15, %v463_v39 }
 0x1b6   :  { %v562_v19 = vmul.f32 %v554_v13, %v870_v12 }
 0x1b7   :  { %v524_v20 = vsub.f32 %v471_v18, %v984_v60 }
 0x1b8   :  { %570 = vst [vmem:[#allocation5 + $0x30] sm:$0xff] %v562_v19 }
 0x1b9   :  { %v532_v21 = vmul.f32 %v524_v20, %v516_v8 }
 0x1bb   :  { %v540_v9 = vmul.f32 0.001118747, %v532_v21 }
 0x1bd   :  { %v548_v22 = vadd.f32 %v984_v60, %v540_v9 }
 0x1bf   :  { %v556_v23 = vmul.f32 %v548_v22, %v858_v61 }
 0x1c1   :  { %564 = vst [vmem:[#allocation5] sm:$0xff] %v556_v23 }
 0x1c2   :  { %721 = shalt.err (!%p718_p9)
}
 0x1c3   :  { %583 = dma.vmem_to_hbm [thread:$0]  %s578_s24, 1024, %s1161_s3, [#allocation4], %s735_s15, %s735_s15, %s736_s16  }
 0x1c4   :  { %732 = dma.done.wait [#allocation4], 1024  }
 0x1c5   :  { %733 = vsyncadd [#allocation4], 4294966272 }
 0x1c6   :  { %587 = vsyncpa [#allocation3], 1 }
 0x1c7   :  { %588 = vsyncpa [#allocation4], 1 }

</bundles_post_ra>
